<compile_context>
chip_gen: v6e
topology: v6e:2x2x1
jax: 0.10.0
libtpu: 0.0.40
codegen_flags: <defaults>
</compile_context>

<pallas_src>
import functools
import math

import jax
import jax.numpy as jnp
from jax.experimental import pallas as pl
from jax.experimental.pallas import tpu as pltpu


_EPS = 1e-8           # torch.nn.CosineSimilarity default eps
_EPS2 = _EPS * _EPS   # clamp applied to the squared norm (sqrt is monotone)

_VMEM_BUDGET = 40 * 1024 * 1024        # tile-selection budget (safe on v7x 64 MiB)
_ROWS_BLOCK_TARGET = 2 * 1024 * 1024   # ~2 MiB per streamed input block (rows path)


def _round_up(a, b):
    return (a + b - 1) // b * b


def _sublane_pack(dtype):
    # dtype-native sublane packing: 8 for 32-bit, 16 for bf16/f16, 32 for 8-bit.
    return max(8, 32 // jnp.dtype(dtype).itemsize)


def _fit_tile(size, align, target):
    """Largest multiple of `align` <= max(target, align) that divides `size`.

    `size` must itself be a multiple of `align`, so this always terminates.
    """
    t = min(max(target, align), size)
    t = (t // align) * align
    while size % t != 0:
        t -= align
    return t


def _vmem_limit_bytes(estimate):
    # Estimate + margin, never below the common 32 MiB scoped default and never
    # above 56 MiB so it stays safe on v7x's 64 MiB physical VMEM.
    return int(min(max(estimate * 5 // 4 + (4 << 20), 32 << 20), 56 << 20))


# ---------------------------------------------------------------------------
# Path 1: outer-product cosine-similarity matrix via MXU matmul
# ---------------------------------------------------------------------------
def _cosine_matmul_kernel(x_ref, y_ref, inv_nx_ref, inv_ny_ref, o_ref):
    # Raw dot products on the MXU, f32 accumulation; contract the shared
    # feature axis directly (no explicit transpose of the y tile).
    raw = jax.lax.dot_general(
        x_ref[...], y_ref[...],
        dimension_numbers=(((1,), (1,)), ((), ())),
        preferred_element_type=jnp.float32,
    )                                          # (TM, TN) f32
    # Reciprocal norms (with 1/temp folded into inv_nx) are precomputed outside
    # the grid -> epilogue is just two broadcast multiplies.
    o_ref[...] = (raw * inv_nx_ref[...] * inv_ny_ref[...]).astype(o_ref.dtype)


def _cosine_matmul(x2, y2, temp, out_dtype):
    """x2: (M, H), y2: (N, H) -> (M, N) cosine similarity / temp (MXU path)."""
    M, H = x2.shape
    N, _ = y2.shape

    in_itemsize = max(jnp.dtype(x2.dtype).itemsize, jnp.dtype(y2.dtype).itemsize)
    out_itemsize = jnp.dtype(out_dtype).itemsize
    packm = max(_sublane_pack(x2.dtype), _sublane_pack(out_dtype))

    # Minimal alignment padding only (sublane pack for M, lane width for N).
    Mp = _round_up(M, packm)
    Np = _round_up(N, 128)

    # Asymmetric tiles: the x block is reused across the inner j axis, so grow
    # TM preferentially (cuts the y re-streaming HBM term); if the VMEM budget
    # is exceeded, shrink TN first (down to 128) and only then TM.
    def vmem_est(tm, tn):
        return (2 * (tm + tn) * H * in_itemsize    # double-buffered x / y tiles
                + 2 * (tm + tn) * 4                # double-buffered norm vectors
                + 2 * tm * tn * out_itemsize)      # double-buffered output tile

    TM = _fit_tile(Mp, packm, 512)
    TN = _fit_tile(Np, 128, 256)
    while vmem_est(TM, TN) > _VMEM_BUDGET and (TM > packm or TN > 128):
        if TN > 128:
            TN = _fit_tile(Np, 128, TN // 2)
        else:
            TM = _fit_tile(Mp, packm, TM // 2)
    # TODO(synk): for very large H (f32 H >= ~8K) add a K grid axis marked
    # "arbitrary" with an f32 VMEM accumulator instead of shrinking the tile.

    x_pad = jnp.pad(x2, ((0, Mp - M), (0, 0))) if Mp != M else x2
    y_pad = jnp.pad(y2, ((0, Np - N), (0, 0))) if Np != N else y2

    # Per-row reciprocal norms hoisted out of the grid (one O((M+N)*H) pass),
    # 1/temp folded into the x-side vector.  Padded rows give 0 similarity.
    xf = x_pad.astype(jnp.float32)
    yf = y_pad.astype(jnp.float32)
    inv_nx = jax.lax.rsqrt(
        jnp.maximum(jnp.sum(xf * xf, axis=-1, keepdims=True), _EPS2)) * (1.0 / temp)
    inv_ny = jax.lax.rsqrt(
        jnp.maximum(jnp.sum(yf * yf, axis=-1, keepdims=True), _EPS2)).T    # (1, Np)

    out_pad = pl.pallas_call(
        _cosine_matmul_kernel,
        out_shape=jax.ShapeDtypeStruct((Mp, Np), out_dtype),
        grid=(Mp // TM, Np // TN),
        in_specs=[
            pl.BlockSpec((TM, H), lambda i, j: (i, 0)),
            pl.BlockSpec((TN, H), lambda i, j: (j, 0)),
            pl.BlockSpec((TM, 1), lambda i, j: (i, 0)),
            pl.BlockSpec((1, TN), lambda i, j: (0, j)),
        ],
        out_specs=pl.BlockSpec((TM, TN), lambda i, j: (i, j)),
        compiler_params=pltpu.CompilerParams(
            dimension_semantics=("parallel", "parallel"),
            vmem_limit_bytes=_vmem_limit_bytes(vmem_est(TM, TN))),
    )(x_pad, y_pad, inv_nx, inv_ny)

    return out_pad if (Mp == M and Np == N) else out_pad[:M, :N]


# ---------------------------------------------------------------------------
# Path 2: element-wise paired cosine similarity, row-tiled grid
# ---------------------------------------------------------------------------
def _cosine_rows_kernel(x_ref, y_ref, o_ref, *, inv_temp):
    x = x_ref[...].astype(jnp.float32)   # (TR, H)
    y = y_ref[...].astype(jnp.float32)

    dot = jnp.sum(x * y, axis=-1)        # (TR,)
    ssx = jnp.sum(x * x, axis=-1)
    ssy = jnp.sum(y * y, axis=-1)
    inv = jax.lax.rsqrt(jnp.maximum(ssx, _EPS2)) * jax.lax.rsqrt(
        jnp.maximum(ssy, _EPS2))

    o_ref[...] = (dot * (inv * inv_temp)).astype(o_ref.dtype)


def _cosine_rows(x2, y2, temp, out_dtype):
    """x2, y2: (R, H) paired rows -> (R,) cosine similarity / temp."""
    R, H = x2.shape
    in_itemsize = max(jnp.dtype(x2.dtype).itemsize, jnp.dtype(y2.dtype).itemsize)
    out_itemsize = jnp.dtype(out_dtype).itemsize

    # Lane-dense, 128-multiple row tiles; TR scales with H targeting ~2 MiB
    # per streamed input block (pure HBM-bandwidth path).
    Rp = _round_up(R, 128)
    tr_target = _round_up(max(_ROWS_BLOCK_TARGET // max(H * in_itemsize, 1), 128), 128)
    TR = _fit_tile(Rp, 128, min(tr_target, 4096))

    x_pad = jnp.pad(x2, ((0, Rp - R), (0, 0))) if Rp != R else x2
    y_pad = jnp.pad(y2, ((0, Rp - R), (0, 0))) if Rp != R else y2

    est = 4 * TR * H * in_itemsize + 2 * TR * out_itemsize
    kernel = functools.partial(_cosine_rows_kernel, inv_temp=1.0 / temp)
    out_pad = pl.pallas_call(
        kernel,
        out_shape=jax.ShapeDtypeStruct((Rp,), out_dtype),
        grid=(Rp // TR,),
        in_specs=[
            pl.BlockSpec((TR, H), lambda i: (i, 0)),
            pl.BlockSpec((TR, H), lambda i: (i, 0)),
        ],
        out_specs=pl.BlockSpec((TR,), lambda i: (i,)),
        compiler_params=pltpu.CompilerParams(
            dimension_semantics=("parallel",),
            vmem_limit_bytes=_vmem_limit_bytes(est)),
    )(x_pad, y_pad)
    return out_pad[:R] if Rp != R else out_pad


# ---------------------------------------------------------------------------
# Public wrapper: Similarity(temp).forward(x, y)
# ---------------------------------------------------------------------------
def similarity(x, y, temp):
    """JAX/Pallas equivalent of Similarity(temp).forward(x, y)."""
    temp = float(temp)
    out_dtype = jnp.result_type(x.dtype, y.dtype)

    nd = max(x.ndim, y.ndim, 1)
    xs = (1,) * (nd - x.ndim) + tuple(x.shape)
    ys = (1,) * (nd - y.ndim) + tuple(y.shape)

    if xs[-1] == ys[-1]:
        H = xs[-1]
        lead_x, lead_y = xs[:-1], ys[:-1]
        shared = [d for d in range(nd - 1) if lead_x[d] > 1 and lead_y[d] > 1]

        if not shared:
            # "Outer product" pattern (SimCSE & friends): every leading axis
            # varies in at most one operand -> full similarity matrix via one
            # MXU matmul, never materializing the (M, N, H) broadcast.
            x_dims = [d for d in range(nd - 1) if lead_x[d] > 1]
            y_dims = [d for d in range(nd - 1) if lead_y[d] > 1]
            M = math.prod(lead_x[d] for d in x_dims) if x_dims else 1
            N = math.prod(lead_y[d] for d in y_dims) if y_dims else 1
            res = _cosine_matmul(x.reshape(M, H), y.reshape(N, H), temp, out_dtype)
            # Un-flatten and interleave the x / y axes back into output order.
            res = res.reshape(tuple(lead_x[d] for d in x_dims)
                              + tuple(lead_y[d] for d in y_dims))
            src = x_dims + y_dims
            order = sorted(range(len(src)), key=lambda a: src[a])
            if order != list(range(len(src))):
                res = jnp.transpose(res, order)
            out_lead = tuple(max(lead_x[d], lead_y[d]) for d in range(nd - 1))
            return res.reshape(out_lead)

        if lead_x == lead_y:
            # Exactly paired rows: no broadcast materialization needed.
            out = _cosine_rows(x.reshape(-1, H), y.reshape(-1, H), temp, out_dtype)
            return out.reshape(lead_x)

    # General broadcast fallback (mixed shared/broadcast leading dims).
    # TODO(synk): express these broadcasts via BlockSpec index_map instead of
    # materializing jnp.broadcast_to.
    full = jnp.broadcast_shapes(xs, ys)
    H = full[-1]
    xb = jnp.broadcast_to(x.reshape(xs), full).reshape(-1, H)
    yb = jnp.broadcast_to(y.reshape(ys), full).reshape(-1, H)
    out = _cosine_rows(xb, yb, temp, out_dtype)
    return out.reshape(full[:-1])


def _reference(x, y, temp):
    xb, yb = jnp.broadcast_arrays(x.astype(jnp.float32), y.astype(jnp.float32))
    dot = jnp.sum(xb * yb, axis=-1)
    nx = jnp.sqrt(jnp.sum(xb * xb, axis=-1))
    ny = jnp.sqrt(jnp.sum(yb * yb, axis=-1))
    return dot / (jnp.maximum(nx, _EPS) * jnp.maximum(ny, _EPS)) / temp


if __name__ == "__main__":
    key = jax.random.PRNGKey(0)
    k1, k2, k3, k4, k5, k6 = jax.random.split(key, 6)
    temp = 0.05

    # 1. SimCSE-style usage: x (B, 1, H) vs y (1, B, H) -> (B, B) matrix.
    B, H = 8, 32
    x = jax.random.normal(k1, (B, 1, H), dtype=jnp.float32)
    y = jax.random.normal(k2, (1, B, H), dtype=jnp.float32)
    out = jax.block_until_ready(similarity(x, y, temp))
    ref = _reference(x, y, temp)
    assert out.shape == (B, B), out.shape
    assert jnp.allclose(out, ref, atol=1e-4, rtol=1e-4)

    # 2. Reversed outer-product broadcast: x (1, 6, H) vs y (7, 1, H) -> (7, 6).
    xr = jax.random.normal(k3, (1, 6, H), dtype=jnp.float32)
    yr = jax.random.normal(k4, (7, 1, H), dtype=jnp.float32)
    outr = jax.block_until_ready(similarity(xr, yr, temp))
    refr = _reference(xr, yr, temp)
    assert outr.shape == (7, 6), outr.shape
    assert jnp.allclose(outr, refr, atol=1e-4, rtol=1e-4)

    # 3. Element-wise paired usage: (2, 8, H) vs (2, 8, H) -> (2, 8).
    xp = jax.random.normal(k5, (2, 8, H), dtype=jnp.float32)
    yp = jax.random.normal(k6, (2, 8, H), dtype=jnp.float32)
    outp = jax.block_until_ready(similarity(xp, yp, temp))
    refp = _reference(xp, yp, temp)
    assert outp.shape == (2, 8), outp.shape
    assert jnp.allclose(outp, refp, atol=1e-4, rtol=1e-4)

    # 4. Mixed-broadcast fallback: (2, 8, H) vs (1, 8, H) -> (2, 8).
    outm = jax.block_until_ready(similarity(xp, yp[:1], temp))
    refm = _reference(xp, yp[:1], temp)
    assert outm.shape == (2, 8), outm.shape
    assert jnp.allclose(outm, refm, atol=1e-4, rtol=1e-4)

    print("KERNEL_OK")
</pallas_src>

<mosaic_0001>
module attributes {stable_mosaic.version = 11 : i64} {
  func.func @_cosine_matmul_kernel(%arg0: i32, %arg1: i32, %arg2: memref<8x32xf32, #tpu.memory_space<vmem>>, %arg3: memref<128x32xf32, #tpu.memory_space<vmem>>, %arg4: memref<8x1xf32, #tpu.memory_space<vmem>>, %arg5: memref<1x128xf32, #tpu.memory_space<vmem>>, %arg6: memref<8x128xf32, #tpu.memory_space<vmem>>) attributes {dimension_semantics = [#tpu.dimension_semantics<parallel>, #tpu.dimension_semantics<parallel>], iteration_bounds = array<i64: 1, 1>, scalar_prefetch = 0 : i64, scratch_operands = 0 : i64, tpu.core_type = #tpu.core_type<tc>, window_params = [{transform_indices = @transform_0, window_bounds = array<i64: 8, 32>}, {transform_indices = @transform_1, window_bounds = array<i64: 128, 32>}, {transform_indices = @transform_2, window_bounds = array<i64: 8, 1>}, {transform_indices = @transform_3, window_bounds = array<i64: 1, 128>}, {transform_indices = @transform_4, window_bounds = array<i64: 8, 128>}]} {
    %c0 = arith.constant 0 : index
    %c0_0 = arith.constant 0 : index
    %0 = vector.load %arg2[%c0, %c0_0] : memref<8x32xf32, #tpu.memory_space<vmem>>, vector<8x32xf32>
    %c0_1 = arith.constant 0 : index
    %c0_2 = arith.constant 0 : index
    %1 = vector.load %arg3[%c0_1, %c0_2] : memref<128x32xf32, #tpu.memory_space<vmem>>, vector<128x32xf32>
    %cst = arith.constant dense<0.000000e+00> : vector<8x128xf32>
    %2 = tpu.matmul %0, %1, %cst {dimension_numbers = #tpu.dot_dimension_numbers<[1], [1], [0], [0], [0, 0, 1, 0], [], []>} : vector<8x32xf32>, vector<128x32xf32>, vector<8x128xf32> -> vector<8x128xf32>
    %c0_3 = arith.constant 0 : index
    %c0_4 = arith.constant 0 : index
    %3 = vector.load %arg4[%c0_3, %c0_4] : memref<8x1xf32, #tpu.memory_space<vmem>>, vector<8x1xf32>
    %4 = vector.broadcast %3 : vector<8x1xf32> to vector<8x128xf32>
    %5 = arith.mulf %2, %4 : vector<8x128xf32>
    %c0_5 = arith.constant 0 : index
    %c0_6 = arith.constant 0 : index
    %6 = vector.load %arg5[%c0_5, %c0_6] : memref<1x128xf32, #tpu.memory_space<vmem>>, vector<1x128xf32>
    %7 = vector.broadcast %6 : vector<1x128xf32> to vector<8x128xf32>
    %8 = arith.mulf %5, %7 : vector<8x128xf32>
    %c0_7 = arith.constant 0 : index
    %c0_8 = arith.constant 0 : index
    %9 = vector.load %arg6[%c0_7, %c0_8] : memref<8x128xf32, #tpu.memory_space<vmem>>, vector<8x128xf32>
    tpu.vector_store %arg6[%c0_7, %c0_8], %8 {strides = array<i32>} : memref<8x128xf32, #tpu.memory_space<vmem>>, vector<8x128xf32>,
    return
  }
  func.func @transform_0(%arg0: i32, %arg1: i32) -> (i32, i32) {
    %c0_i32 = arith.constant 0 : i32
    %c0_i32_0 = arith.constant 0 : i32
    return %arg0, %c0_i32 : i32, i32
  }
  func.func @transform_1(%arg0: i32, %arg1: i32) -> (i32, i32) {
    %c0_i32 = arith.constant 0 : i32
    %c0_i32_0 = arith.constant 0 : i32
    return %arg1, %c0_i32 : i32, i32
  }
  func.func @transform_2(%arg0: i32, %arg1: i32) -> (i32, i32) {
    %c0_i32 = arith.constant 0 : i32
    %c0_i32_0 = arith.constant 0 : i32
    return %arg0, %c0_i32 : i32, i32
  }
  func.func @transform_3(%arg0: i32, %arg1: i32) -> (i32, i32) {
    %c0_i32 = arith.constant 0 : i32
    %c0_i32_0 = arith.constant 0 : i32
    return %c0_i32, %arg1 : i32, i32
  }
  func.func @transform_4(%arg0: i32, %arg1: i32) -> (i32, i32) {
    %c0_i32 = arith.constant 0 : i32
    return %arg0, %arg1 : i32, i32
  }
}

</mosaic_0001>

<bundles_post_ra>
// kernel: tpu_custom_call.1
= control target key start
LH: loop header
LB: loop body
LE: loop exit
PB: predicated region body
PF: predicated region fallthrough
CT: control target
= control target key end

     0   :  { %vm35_vm0 = vcmask 261120   ;;  %v284_v1 = vmov 0.0   ;;  %vm285_vm1 = vmmov 0   ;;  %v286_v2 = vmov 0   ;;  %s390_s0 = inlined_call_operand.vmem [shape: f32[8,32], index: 0, kind: input, shape index: {}]   ;;  %s391_s1 = inlined_call_operand.vmem [shape: f32[128,32], index: 1, kind: input, shape index: {}]   ;;  %s392_s2 = inlined_call_operand.vmem [shape: f32[8,1], index: 2, kind: input, shape index: {}]   ;;  %s393_s3 = inlined_call_operand.vmem [shape: f32[1,128], index: 3, kind: input, shape index: {}]   ;;  %s394_s4 = inlined_call_operand.hbm [shape: f32[8,128], index: 4, kind: output, shape index: {}]  }
   0x1   :  { %v34_v0 = vld [vmem:[%s391_s1 + $0x78] sm:$0xff]  ;;  %222 = vmatprep.subr.mxu0 %v284_v1  ;;  %254 = vmatprep.mubr.msk.f32.mxu0 %vm285_vm1, %v284_v1  ;;  %v33_v3 = vld [vmem:[%s391_s1 + $0x70] sm:$0xff]  ;;  %v157_v4 = vld [vmem:[%s392_s2] sm:$0xff] }
   0x2   :  { %223 = vmatpush3.xpose.msk.msra.mxu0 %vm35_vm0, %v34_v0  ;;  %261 = vset.pattern.permute.xlu0 %v286_v2 }
   0x3   :  { %224 = vmatprep.subr.mxu0 %v284_v1  ;;  %160 = vperm.xlu0 %261, %v157_v4  }
   0x6   :  { %225 = vmatpush3.xpose.msk.msra.mxu0 %vm35_vm0, %v33_v3 }
   0x7   :  { %9 = vsyncpa [#allocation3], 0  ;;  %226 = vmatprep.subr.mxu0 %v284_v1  ;;  %v32_v5 = vld [vmem:[%s391_s1 + $0x68] sm:$0xff]  ;;  %v31_v6 = vld [vmem:[%s391_s1 + $0x60] sm:$0xff]  ;;  %s287_s25 = smov [#allocation2]  }
   0x8   :  { %v30_v7 = vld [vmem:[%s391_s1 + $0x58] sm:$0xff]  ;;  %v29_v8 = vld [vmem:[%s391_s1 + $0x50] sm:$0xff]  ;;  %v28_v9 = vld [vmem:[%s391_s1 + $0x48] sm:$0xff]  ;;  %s179_s26 = sshll.u32 %s287_s25, 4  ;;  %s180_s26 = int_to_ptr.vmem [resolvable:$true] %s179_s26 }
   0x9   :  { %v27_v10 = vld [vmem:[%s391_s1 + $0x40] sm:$0xff]  ;;  %v26_v11 = vld [vmem:[%s391_s1 + $0x38] sm:$0xff]  ;;  %v25_v12 = vld [vmem:[%s391_s1 + $0x30] sm:$0xff]  ;;  %p267_p1 = scmp.lt.s32.totalorder %s180_s26, %s180_s26 }
   0xa   :  { %227 = vmatpush3.xpose.msk.msra.mxu0 %vm35_vm0, %v32_v5  ;;  %v24_v13 = vld [vmem:[%s391_s1 + $0x28] sm:$0xff]  ;;  %v23_v14 = vld [vmem:[%s391_s1 + $0x20] sm:$0xff]  ;;  %v22_v15 = vld [vmem:[%s391_s1 + $0x18] sm:$0xff] }
   0xb   :  { %228 = vmatprep.subr.mxu0 %v284_v1  ;;  %v21_v16 = vld [vmem:[%s391_s1 + $0x10] sm:$0xff]  ;;  %v20_v17 = vld [vmem:[%s391_s1 + $0x8] sm:$0xff]  ;;  %v19_v18 = vld [vmem:[%s391_s1] sm:$0xff]  ;;  %s262_s1 = scalar_lea.vmem %s180_s26, 128 }
   0xc   :  { %v18_v19 = vld [vmem:[%s390_s0] sm:$0xff]  ;;  %p263_p0 = scmp.ne.s32.totalorder %s180_s26, %s262_s1  ;;  %p268_p2 = scmp.lt.s32.totalorder %s262_s1, %s262_s1 }
   0xd   :  { %v204_v22 = vld [vmem:[%s393_s3] ss:$0 sm:$0xff] }
   0xe   :  { %229 = vmatpush3.xpose.msk.msra.mxu0 %vm35_vm0, %v31_v6  ;;  %p269_p3 = por %p268_p2, %p267_p1 }
   0xf   :  { %230 = vmatprep.subr.mxu0 %v284_v1 }
  0x10   :  { %p270_p4 = pnand %p269_p3, %p263_p0 }
  0x12   :  { %231 = vmatpush3.xpose.msk.msra.mxu0 %vm35_vm0, %v30_v7 }
  0x13   :  { %232 = vmatprep.subr.mxu0 %v284_v1 }
  0x16   :  { %233 = vmatpush3.xpose.msk.msra.mxu0 %vm35_vm0, %v29_v8 }
  0x17   :  { %234 = vmatprep.subr.mxu0 %v284_v1 }
  0x1a   :  { %235 = vmatpush3.xpose.msk.msra.mxu0 %vm35_vm0, %v28_v9 }
  0x1b   :  { %236 = vmatprep.subr.mxu0 %v284_v1 }
  0x1e   :  { %237 = vmatpush3.xpose.msk.msra.mxu0 %vm35_vm0, %v27_v10 }
  0x1f   :  { %238 = vmatprep.subr.mxu0 %v284_v1 }
  0x22   :  { %239 = vmatpush3.xpose.msk.msra.mxu0 %vm35_vm0, %v26_v11 }
  0x23   :  { %240 = vmatprep.subr.mxu0 %v284_v1 }
  0x26   :  { %241 = vmatpush3.xpose.msk.msra.mxu0 %vm35_vm0, %v25_v12 }
  0x27   :  { %242 = vmatprep.subr.mxu0 %v284_v1 }
  0x2a   :  { %243 = vmatpush3.xpose.msk.msra.mxu0 %vm35_vm0, %v24_v13 }
  0x2b   :  { %244 = vmatprep.subr.mxu0 %v284_v1 }
  0x2e   :  { %245 = vmatpush3.xpose.msk.msra.mxu0 %vm35_vm0, %v23_v14 }
  0x2f   :  { %246 = vmatprep.subr.mxu0 %v284_v1 }
  0x32   :  { %247 = vmatpush3.xpose.msk.msra.mxu0 %vm35_vm0, %v22_v15 }
  0x33   :  { %248 = vmatprep.subr.mxu0 %v284_v1 }
  0x36   :  { %249 = vmatpush3.xpose.msk.msra.mxu0 %vm35_vm0, %v21_v16 }
  0x37   :  { %250 = vmatprep.subr.mxu0 %v284_v1 }
  0x3a   :  { %251 = vmatpush3.xpose.msk.msra.mxu0 %vm35_vm0, %v20_v17 }
  0x3b   :  { %252 = vmatprep.subr.mxu0 %v284_v1 }
  0x3e   :  { %253 = vmatpush3.xpose.msk.msra.mxu0 %vm35_vm0, %v19_v18 }
  0x41   :  { %255 = vmatmul.mubr.msk.f32.vlgmr.msra.gmra.mxu0 %vm35_vm0, %v18_v19 }
  0x7e   :  { %v161_v20 = vpop.permute.xlu0 %160 }
 0x101   :  { %v153_v21 = vpop.f32.mrf.mxu0 }
 0x102   :  { %v163_v23 = vmul.f32 %v161_v20, %v153_v21 }
 0x103   :  { %v256_v24 = vpop.f32.mrf.mxu0 }
 0x104   :  { %v171_v25 = vmul.f32 %v204_v22, %v163_v23 }
 0x106   :  { %172 = vst [vmem:[#allocation2] sm:$0xff] %v171_v25 }
 0x107   :  { %273 = shalt.err (!%p270_p4)
}
 0x108   :  { %182 = dma.vmem_to_hbm [thread:$0]  %s180_s26, 128, %s394_s4, [#allocation3]  }
 0x109   :  { %282 = dma.done.wait [#allocation3], 128  }
 0x10a   :  { %283 = vsyncadd [#allocation3], 4294967168 }
 0x10b   :  { %186 = vsyncpa [#allocation3], 1 }

</bundles_post_ra>
